<compile_context>
chip_gen: v6e
topology: v6e:2x2x1
jax: 0.10.0
libtpu: 0.0.40
codegen_flags: <defaults>
</compile_context>

<pallas_src>
import jax
import jax.numpy as jnp
from jax.experimental import pallas as pl
from jax.experimental.pallas import tpu as pltpu

LANES = 128
TARGET_BLOCK_BYTES = 4 << 20     # ~4 MiB per input block
VMEM_LIMIT_BYTES = 40 << 20      # 2 specs x 2 buffers x 4 MiB = 16 MiB + headroom


def _scalar_layer_kernel(wb_ref, x_ref, o_ref):
    # wb_ref: (1, 2) f32 in SMEM -> [weight, bias]; x_ref/o_ref: (tile_rows, 128) VMEM tiles.
    w = wb_ref[0, 0]
    b = wb_ref[0, 1]
    y = w * x_ref[...].astype(jnp.float32) + b   # f32 math; free filler under HBM bound
    o_ref[...] = y.astype(o_ref.dtype)           # cast on store


def scalar_layer(x, weight, bias, donate_input=False):
    """Elementwise y = weight * x + bias with scalar weight/bias, via Pallas.

    x: arbitrary-shape (float) array, e.g. NCHW. Returns same shape/dtype.
    donate_input=True aliases the input buffer to the output (x is consumed).
    """
    orig_shape = x.shape
    dtype = x.dtype
    itemsize = x.dtype.itemsize

    flat = x.reshape(-1)
    n = flat.shape[0]
    if n == 0:                          # empty-tensor guard (0-row block won't lower)
        return x

    # Pad (only if needed) so the flat array reshapes to (rows, 128). Only the
    # BLOCK shape needs (8,128) alignment; rows itself may be any value.
    padded_n = pl.cdiv(n, LANES) * LANES
    if padded_n != n:
        flat = jnp.pad(flat, (0, padded_n - n))
    rows = padded_n // LANES
    x2d = flat.reshape(rows, LANES)

    # Sub-32-bit dtypes pack along sublanes: f32 -> 8, bf16 -> 16, int8/fp8 -> 32.
    sublanes = 8 * max(1, 4 // itemsize)

    # ~4 MiB input block (multiple of the packed-sublane granule), fixed size;
    # pl.cdiv grid lets Pallas mask a partial last block instead of shrinking tiles.
    tile_rows = TARGET_BLOCK_BYTES // (LANES * itemsize)
    tile_rows = max(sublanes, (tile_rows // sublanes) * sublanes)
    if tile_rows >= rows:
        tile_rows = rows                # single full-array block (any row count is legal)
    grid = (pl.cdiv(rows, tile_rows),)

    wb = jnp.stack([jnp.asarray(weight, dtype=jnp.float32),
                    jnp.asarray(bias, dtype=jnp.float32)]).reshape(1, 2)

    out2d = pl.pallas_call(
        _scalar_layer_kernel,
        out_shape=jax.ShapeDtypeStruct((rows, LANES), dtype),
        grid=grid,
        in_specs=[
            pl.BlockSpec(memory_space=pltpu.SMEM),              # [weight, bias] scalars
            pl.BlockSpec((tile_rows, LANES), lambda i: (i, 0)),
        ],
        out_specs=pl.BlockSpec((tile_rows, LANES), lambda i: (i, 0)),
        compiler_params=pltpu.CompilerParams(
            dimension_semantics=("parallel",),
            vmem_limit_bytes=VMEM_LIMIT_BYTES,
        ),
        cost_estimate=pl.CostEstimate(
            flops=2 * n,
            transcendentals=0,
            bytes_accessed=2 * rows * LANES * itemsize,
        ),
        input_output_aliases=({1: 0} if donate_input else {}),
    )(wb, x2d)

    if padded_n == n:
        return out2d.reshape(orig_shape)
    return out2d.reshape(-1)[:n].reshape(orig_shape)


if __name__ == "__main__":
    key = jax.random.PRNGKey(0)

    # ScalarLayer params (non-trivial so the affine transform is exercised).
    weight = jnp.float32(1.5)
    bias = jnp.float32(-0.25)

    # Main test: NCHW, batch=2, channels=4, spatial=16x16 (aligned: no pad / no slice).
    x = jax.random.normal(key, (2, 4, 16, 16), dtype=jnp.float32)
    y = jax.block_until_ready(scalar_layer(x, weight, bias))
    y_ref = weight * x + bias
    assert y.shape == x.shape and y.dtype == x.dtype
    assert jnp.allclose(y, y_ref, atol=1e-6, rtol=1e-6), "f32 mismatch vs reference"

    # Awkward shape: exercises the lane-only pad / trailing-slice path.
    key2 = jax.random.PRNGKey(1)
    x_odd = jax.random.normal(key2, (3, 5, 7, 11), dtype=jnp.float32)
    y_odd = jax.block_until_ready(scalar_layer(x_odd, weight, bias))
    assert y_odd.shape == x_odd.shape and y_odd.dtype == x_odd.dtype
    assert jnp.allclose(y_odd, weight * x_odd + bias, atol=1e-6, rtol=1e-6), \
        "odd-shape mismatch vs reference"

    # bf16: f32 math inside the kernel, cast on store.
    x_bf16 = jax.random.normal(key, (2, 4, 16, 16), dtype=jnp.float32).astype(jnp.bfloat16)
    y_bf16 = jax.block_until_ready(scalar_layer(x_bf16, weight, bias))
    y_bf16_ref = (weight * x_bf16.astype(jnp.float32) + bias).astype(jnp.bfloat16)
    assert y_bf16.dtype == jnp.bfloat16
    assert jnp.allclose(y_bf16.astype(jnp.float32), y_bf16_ref.astype(jnp.float32),
                        atol=1e-2, rtol=1e-2), "bf16 mismatch vs reference"

    print("KERNEL_OK")
</pallas_src>

<mosaic_0001>
module attributes {stable_mosaic.version = 11 : i64} {
  func.func @_scalar_layer_kernel(%arg0: i32, %arg1: memref<1x2xf32, #tpu.memory_space<smem>>, %arg2: memref<16x128xf32, #tpu.memory_space<vmem>>, %arg3: memref<16x128xf32, #tpu.memory_space<vmem>>) attributes {dimension_semantics = [#tpu.dimension_semantics<parallel>], iteration_bounds = array<i64: 1>, scalar_prefetch = 0 : i64, scratch_operands = 0 : i64, tpu.core_type = #tpu.core_type<tc>, window_params = [{transform_indices = @transform_0, window_bounds = array<i64: 1, 2>}, {transform_indices = @transform_1, window_bounds = array<i64: 16, 128>}, {transform_indices = @transform_2, window_bounds = array<i64: 16, 128>}]} {
    %c0 = arith.constant 0 : index
    %c0_0 = arith.constant 0 : index
    %0 = memref.load %arg1[%c0, %c0_0] : memref<1x2xf32, #tpu.memory_space<smem>>
    %c0_1 = arith.constant 0 : index
    %c1 = arith.constant 1 : index
    %1 = memref.load %arg1[%c0_1, %c1] : memref<1x2xf32, #tpu.memory_space<smem>>
    %c0_2 = arith.constant 0 : index
    %c0_3 = arith.constant 0 : index
    %2 = vector.load %arg2[%c0_2, %c0_3] : memref<16x128xf32, #tpu.memory_space<vmem>>, vector<16x128xf32>
    %3 = vector.broadcast %0 : f32 to vector<16x128xf32>
    %4 = arith.mulf %3, %2 : vector<16x128xf32>
    %5 = vector.broadcast %1 : f32 to vector<16x128xf32>
    %6 = arith.addf %4, %5 : vector<16x128xf32>
    %c0_4 = arith.constant 0 : index
    %c0_5 = arith.constant 0 : index
    %7 = vector.load %arg3[%c0_4, %c0_5] : memref<16x128xf32, #tpu.memory_space<vmem>>, vector<16x128xf32>
    tpu.vector_store %arg3[%c0_4, %c0_5], %6 {strides = array<i32>} : memref<16x128xf32, #tpu.memory_space<vmem>>, vector<16x128xf32>,
    return
  }
  func.func @transform_0(%arg0: i32) -> (i32, i32) {
    %c0_i32 = arith.constant 0 : i32
    %c0_i32_0 = arith.constant 0 : i32
    %c0_i32_1 = arith.constant 0 : i32
    return %c0_i32, %c0_i32_0 : i32, i32
  }
  func.func @transform_1(%arg0: i32) -> (i32, i32) {
    %c0_i32 = arith.constant 0 : i32
    %c0_i32_0 = arith.constant 0 : i32
    return %arg0, %c0_i32 : i32, i32
  }
  func.func @transform_2(%arg0: i32) -> (i32, i32) {
    %c0_i32 = arith.constant 0 : i32
    %c0_i32_0 = arith.constant 0 : i32
    return %arg0, %c0_i32 : i32, i32
  }
}

</mosaic_0001>

<bundles_post_ra>
// kernel: tpu_custom_call.1
= control target key start
LH: loop header
LB: loop body
LE: loop exit
PB: predicated region body
PF: predicated region fallthrough
CT: control target
= control target key end

     0   :  { %7 = vsyncpa [#allocation5], 0  ;;  %s162_s0 = inlined_call_operand.hbm [shape: f32[1,2], index: 0, kind: input, shape index: {}]   ;;  %s163_s1 = inlined_call_operand.hbm [shape: f32[16,128], index: 1, kind: input, shape index: {}]   ;;  %s164_s2 = inlined_call_operand.hbm [shape: f32[16,128], index: 2, kind: output, shape index: {}]  }
   0x1   :  { %8 = vsyncpa [#allocation3], 0 }
   0x2   :  { %9 = vsyncpa [#allocation4], 0  ;;  %s127_s9 = smov [#allocation2]   ;;  %s128_s12 = smov [#allocation6]  }
   0x3   :  { %17 = dma.hbm_to_smem %s162_s0, 16, %s127_s9, [#allocation5]  }
   0x4   :  { %s23_s13 = sshll.u32 %s128_s12, 4  ;;  %s24_s13 = int_to_ptr.vmem [resolvable:$true] %s23_s13 }
   0x5   :  { %s89_s14 = scalar_lea.vmem %s24_s13, 256  ;;  %p94_p1 = scmp.lt.s32.totalorder %s24_s13, %s24_s13 }
   0x6   :  { %p90_p0 = scmp.ne.s32.totalorder %s24_s13, %s89_s14  ;;  %p95_p2 = scmp.lt.s32.totalorder %s89_s14, %s89_s14 }
   0x8   :  { %p96_p3 = por %p95_p2, %p94_p1 }
   0xa   :  { %p97_p4 = pnand %p96_p3, %p90_p0 }
   0xc   :  { %100 = shalt.err (!%p97_p4)
}
   0xd   :  { %s129_s15 = smov 128   ;;  %s130_s16 = smov 8  }
   0xe   :  { %29 = dma.hbm_to_vmem [thread:$0]  %s163_s1, 256, %s24_s13, [#allocation3], %s129_s15, %s129_s15, %s130_s16  }
   0xf   :  { %121 = dma.done.wait [#allocation5], 16  }
  0x10   :  { %122 = vsyncadd [#allocation5], 4294967280 }
  0x11   :  { %123 = dma.done.wait [#allocation3], 256  }
  0x12   :  { %124 = vsyncadd [#allocation3], 4294967040 }
  0x13   :  { %36 = sfence }
  0x14   :  { %s37_s0 = sld [smem:[#allocation2]]  ;;  %v39_v0 = vld [vmem:[#allocation6] sm:$0xff]  ;;  %v40_v1 = vld [vmem:[#allocation6 + $0x8] sm:$0xff]  ;;  %s131_s20 = smov [#allocation7]  }
  0x15   :  { %s67_s19 = sld [smem:[#allocation2 + $0x1]]  ;;  %s54_s21 = sshll.u32 %s131_s20, 4  ;;  %s55_s21 = int_to_ptr.vmem [resolvable:$true] %s54_s21 }
  0x16   :  { %s101_s1 = scalar_lea.vmem %s55_s21, 256  ;;  %p106_p6 = scmp.lt.s32.totalorder %s55_s21, %s55_s21 }
  0x17   :  { %p102_p5 = scmp.ne.s32.totalorder %s55_s21, %s101_s1  ;;  %p107_p7 = scmp.lt.s32.totalorder %s101_s1, %s101_s1 }
  0x19   :  { %p108_p8 = por %p107_p7, %p106_p6 }
  0x1a   :  { %v41_v2 = vstv %s37_s0 }
  0x1b   :  { %v42_v3 = vmul.f32 %v41_v2, %v39_v0  ;;  %v44_v4 = vstv %s67_s19  ;;  %v43_v5 = vmul.f32 %v41_v2, %v40_v1  ;;  %p109_p9 = pnand %p108_p8, %p102_p5 }
  0x1d   :  { %v45_v6 = vadd.f32 %v44_v4, %v42_v3  ;;  %v46_v7 = vadd.f32 %v44_v4, %v43_v5 }
  0x1f   :  { %47 = vst [vmem:[#allocation7] sm:$0xff] %v45_v6  ;;  %48 = vst [vmem:[#allocation7 + $0x8] sm:$0xff] %v46_v7 }
  0x20   :  { %112 = shalt.err (!%p109_p9)
}
  0x21   :  { %60 = dma.vmem_to_hbm [thread:$0]  %s55_s21, 256, %s164_s2, [#allocation4], %s129_s15, %s129_s15, %s130_s16  }
  0x22   :  { %125 = dma.done.wait [#allocation4], 256  }
  0x23   :  { %126 = vsyncadd [#allocation4], 4294967040 }
  0x24   :  { %64 = vsyncpa [#allocation3], 1 }
  0x25   :  { %65 = vsyncpa [#allocation4], 1 }
  0x26   :  { %66 = vsyncpa [#allocation5], 1 }

</bundles_post_ra>
